<compile_context>
chip_gen: v7x
topology: tpu7x:2x2x1
jax: 0.10.0
libtpu: 0.0.40
codegen_flags: <defaults>
</compile_context>

<pallas_src>
import jax
import jax.numpy as jnp
from jax.experimental import pallas as pl
from jax.experimental.pallas import tpu as pltpu

ALPHA = 0.01     # LeakyReLU negative slope
BN_EPS = 1e-5    # PyTorch BatchNorm1d default


def _encoder_kernel(xc_ref,            # (B, S+C)   per-grid-step activations
                    w1_ref,            # (S+C, H)   resident across grid steps
                    w2_ref,            # (H, H)
                    bn_ref,            # (4, H): rows = [g1, be1, g2, be2]
                    whb_ref,           # (H+1, 2L): [wm|wv] stacked over [bm|bv]
                    m_ref, v_ref):     # (B, L), (B, L)
    """Entire encoder hot path: 3 matmuls + 2 training-mode batch-norms."""
    H = w2_ref.shape[0]
    L = m_ref.shape[-1]

    def bn_lrelu(h, g, be):
        # Training-mode BatchNorm1d: batch stats, biased variance (two-pass).
        mu = jnp.mean(h, axis=0, keepdims=True)
        d = h - mu
        var = jnp.mean(d * d, axis=0, keepdims=True)
        h = d * (g * jax.lax.rsqrt(var + BN_EPS)) + be   # gamma folded into rsqrt
        return jnp.where(h >= 0, h, ALPHA * h)           # LeakyReLU

    # ---- fc1 (bias folded away by BN) + BN1 + LeakyReLU ----
    h = jnp.dot(xc_ref[...], w1_ref[...], preferred_element_type=jnp.float32)
    h = bn_lrelu(h, bn_ref[0:1, :], bn_ref[1:2, :])

    # ---- fc2 (bias folded away by BN) + BN2 + LeakyReLU ----
    h = jnp.dot(h, w2_ref[...], preferred_element_type=jnp.float32)
    h = bn_lrelu(h, bn_ref[2:3, :], bn_ref[3:4, :])

    # ---- fused heads: [z_mean | z_log_var] matmul + bias row + tanh ----
    o = (jnp.dot(h, whb_ref[:H, :], preferred_element_type=jnp.float32)
         + whb_ref[H:H + 1, :])
    o = jnp.tanh(o)
    m_ref[...] = o[:, :L]
    v_ref[...] = o[:, L:]


def pack_params(p):
    """Preprocess PyTorch-style params once (outside the hot path)."""
    assert p["g1"].shape[1] == p["g2"].shape[1], \
        "BN packing assumes hidden_size_IP == hidden_size_rest"
    wh = jnp.concatenate([p["wm"], p["wv"]], axis=1)   # (H, 2L)
    bh = jnp.concatenate([p["bm"], p["bv"]], axis=1)   # (1, 2L)
    return {
        "w1":  p["w1"],                                                     # (S+C, H)
        "w2":  p["w2"],                                                     # (H, H)
        "bn":  jnp.concatenate([p["g1"], p["be1"], p["g2"], p["be2"]], 0),  # (4, H)
        "whb": jnp.concatenate([wh, bh], axis=0),                           # (H+1, 2L)
    }


def _build_call(N, B, SC, H, L):
    """One pallas_call over a grid of N independent encoder invocations."""
    L2 = 2 * L
    flops = N * (2 * B * SC * H + 2 * B * H * H + 2 * B * H * L2)
    bytes_accessed = 4 * (N * B * SC + SC * H + H * H + 4 * H
                          + (H + 1) * L2 + 2 * N * B * L)
    cost = pl.CostEstimate(flops=flops,
                           transcendentals=N * B * L2,
                           bytes_accessed=bytes_accessed)

    const = lambda n: (0, 0)          # weights: same block every step -> VMEM-resident
    return pl.pallas_call(
        _encoder_kernel,
        grid=(N,),
        in_specs=[
            pl.BlockSpec((None, B, SC), lambda n: (n, 0, 0)),   # xc, per step
            pl.BlockSpec((SC, H), const),                       # w1
            pl.BlockSpec((H, H), const),                        # w2
            pl.BlockSpec((4, H), const),                        # bn pack
            pl.BlockSpec((H + 1, L2), const),                   # fused head w|b
        ],
        out_specs=(
            pl.BlockSpec((None, B, L), lambda n: (n, 0, 0)),    # means
            pl.BlockSpec((None, B, L), lambda n: (n, 0, 0)),    # log_vars
        ),
        out_shape=(jax.ShapeDtypeStruct((N, B, L), jnp.float32),
                   jax.ShapeDtypeStruct((N, B, L), jnp.float32)),
        compiler_params=pltpu.CompilerParams(
            dimension_semantics=("parallel",)),
        cost_estimate=cost,
    )


@jax.jit
def encoder_forward_stacked(xs, cs, pp):
    """Launch-amortized path.

    xs: (N, B, state_size), cs: (N, B, condi_size).
    Returns (means, log_vars), each (N, B, latent_size).
    NOTE: BN stats are computed per call (per leading index n), matching N
    independent invocations of the PyTorch module in training mode.
    """
    xc = jnp.concatenate([xs, cs], axis=-1).astype(jnp.float32)  # (N, B, S+C)
    N, B, SC = xc.shape
    H = pp["w2"].shape[0]
    L = pp["whb"].shape[1] // 2
    call = _build_call(N, B, SC, H, L)
    return call(xc, pp["w1"], pp["w2"], pp["bn"], pp["whb"])


@jax.jit
def encoder_forward(x, c, pp):
    """Single-call convenience wrapper. x: (B, S), c: (B, C)."""
    m, v = encoder_forward_stacked(x[None], c[None], pp)
    return m[0], v[0]


def init_params(key, state_size=2, condi_size=2,
                hidden_ip=32, hidden_rest=32, latent_size=6):
    """PyTorch-style Linear init (U[-1/sqrt(fan_in), 1/sqrt(fan_in)]).

    BatchNorm: gamma=1, beta=0 (PyTorch default). Weights stored as (in, out)
    so x @ W is equivalent to PyTorch x @ W.T with W (out, in)."""
    in_size = state_size + condi_size
    ks = jax.random.split(key, 8)

    def lin(kw, kb, fan_in, fan_out):
        bound = 1.0 / jnp.sqrt(jnp.float32(fan_in))
        w = jax.random.uniform(kw, (fan_in, fan_out), jnp.float32, -bound, bound)
        b = jax.random.uniform(kb, (1, fan_out), jnp.float32, -bound, bound)
        return w, b

    w1, b1 = lin(ks[0], ks[1], in_size, hidden_ip)
    w2, b2 = lin(ks[2], ks[3], hidden_ip, hidden_rest)
    wm, bm = lin(ks[4], ks[5], hidden_rest, latent_size)
    wv, bv = lin(ks[6], ks[7], hidden_rest, latent_size)
    return {
        "w1": w1, "b1": b1,
        "g1": jnp.ones((1, hidden_ip), jnp.float32),
        "be1": jnp.zeros((1, hidden_ip), jnp.float32),
        "w2": w2, "b2": b2,
        "g2": jnp.ones((1, hidden_rest), jnp.float32),
        "be2": jnp.zeros((1, hidden_rest), jnp.float32),
        "wm": wm, "bm": bm,
        "wv": wv, "bv": bv,
    }


def _reference_forward(x, c, p):
    """Pure-JAX reference mirroring the PyTorch module exactly
    (with fc biases and two-pass biased variance)."""
    def bn(h, g, b):
        mu = jnp.mean(h, axis=0, keepdims=True)
        var = jnp.mean((h - mu) ** 2, axis=0, keepdims=True)
        return (h - mu) / jnp.sqrt(var + BN_EPS) * g + b

    def lrelu(h):
        return jnp.where(h >= 0, h, ALPHA * h)

    h = jnp.concatenate([x, c], axis=1).astype(jnp.float32)
    h = lrelu(bn(h @ p["w1"] + p["b1"], p["g1"], p["be1"]))
    h = lrelu(bn(h @ p["w2"] + p["b2"], p["g2"], p["be2"]))
    return jnp.tanh(h @ p["wm"] + p["bm"]), jnp.tanh(h @ p["wv"] + p["bv"])


if __name__ == "__main__":
    key = jax.random.PRNGKey(0)
    kx, kc, kp = jax.random.split(key, 3)

    N, B, STATE, CONDI = 4, 8, 2, 2          # N stacked calls, batch 8 each
    HIDDEN, LATENT = 32, 6
    xs = jax.random.normal(kx, (N, B, STATE), jnp.float32)
    cs = jax.random.normal(kc, (N, B, CONDI), jnp.float32)

    params = init_params(kp, state_size=STATE, condi_size=CONDI,
                         hidden_ip=HIDDEN, hidden_rest=HIDDEN,
                         latent_size=LATENT)
    packed = pack_params(params)

    # Launch-amortized path: one pallas_call, grid over N calls,
    # weights held VMEM-resident.
    ms, vs = encoder_forward_stacked(xs, cs, packed)
    jax.block_until_ready((ms, vs))

    # Single-call path.
    m1, v1 = encoder_forward(xs[0], cs[0], packed)
    jax.block_until_ready((m1, v1))

    # TODO(synk): the PyTorch try/except fallbacks (dim=0 cat of squeezed 1-D
    # inputs and the x[None] re-batching path) are degenerate-shape rescue
    # paths and are not implemented; only the standard batched path is.
    for n in range(N):
        rm, rv = _reference_forward(xs[n], cs[n], params)
        assert jnp.allclose(ms[n], rm, atol=1e-4, rtol=1e-4)
        assert jnp.allclose(vs[n], rv, atol=1e-4, rtol=1e-4)
    rm0, rv0 = _reference_forward(xs[0], cs[0], params)
    assert jnp.allclose(m1, rm0, atol=1e-4, rtol=1e-4)
    assert jnp.allclose(v1, rv0, atol=1e-4, rtol=1e-4)

    print("KERNEL_OK")
</pallas_src>

<mosaic_0001>
module attributes {stable_mosaic.version = 11 : i64} {
  func.func @_encoder_kernel(%arg0: i32, %arg1: memref<1x8x4xf32, #tpu.memory_space<vmem>>, %arg2: memref<4x32xf32, #tpu.memory_space<vmem>>, %arg3: memref<32x32xf32, #tpu.memory_space<vmem>>, %arg4: memref<4x32xf32, #tpu.memory_space<vmem>>, %arg5: memref<33x12xf32, #tpu.memory_space<vmem>>, %arg6: memref<1x8x6xf32, #tpu.memory_space<vmem>>, %arg7: memref<1x8x6xf32, #tpu.memory_space<vmem>>) attributes {dimension_semantics = [#tpu.dimension_semantics<parallel>], iteration_bounds = array<i64: 4>, scalar_prefetch = 0 : i64, scratch_operands = 0 : i64, tpu.core_type = #tpu.core_type<tc>, window_params = [{transform_indices = @transform_0, window_bounds = array<i64: 1, 8, 4>}, {pipeline_mode = #tpu.pipeline_mode<synchronous>, transform_indices = @transform_1, window_bounds = array<i64: 4, 32>}, {pipeline_mode = #tpu.pipeline_mode<synchronous>, transform_indices = @transform_2, window_bounds = array<i64: 32, 32>}, {pipeline_mode = #tpu.pipeline_mode<synchronous>, transform_indices = @transform_3, window_bounds = array<i64: 4, 32>}, {pipeline_mode = #tpu.pipeline_mode<synchronous>, transform_indices = @transform_4, window_bounds = array<i64: 33, 12>}, {transform_indices = @transform_5, window_bounds = array<i64: 1, 8, 6>}, {transform_indices = @transform_6, window_bounds = array<i64: 1, 8, 6>}]} {
    %c0 = arith.constant 0 : index
    %c0_0 = arith.constant 0 : index
    %c0_1 = arith.constant 0 : index
    %0 = vector.load %arg1[%c0, %c0_0, %c0_1] : memref<1x8x4xf32, #tpu.memory_space<vmem>>, vector<1x8x4xf32>
    %1 = vector.shape_cast %0 : vector<1x8x4xf32> to vector<8x4xf32>
    %c0_2 = arith.constant 0 : index
    %c0_3 = arith.constant 0 : index
    %2 = vector.load %arg2[%c0_2, %c0_3] : memref<4x32xf32, #tpu.memory_space<vmem>>, vector<4x32xf32>
    %cst = arith.constant dense<0.000000e+00> : vector<8x32xf32>
    %3 = tpu.matmul %1, %2, %cst {dimension_numbers = #tpu.dot_dimension_numbers<[1], [0], [0], [1], [0, 0, 1, 1], [], []>} : vector<8x4xf32>, vector<4x32xf32>, vector<8x32xf32> -> vector<8x32xf32>
    %c0_4 = arith.constant 0 : index
    %c0_5 = arith.constant 0 : index
    %4 = vector.load %arg4[%c0_4, %c0_5] : memref<4x32xf32, #tpu.memory_space<vmem>>, vector<1x32xf32>
    %c1 = arith.constant 1 : index
    %c0_6 = arith.constant 0 : index
    %5 = vector.load %arg4[%c1, %c0_6] : memref<4x32xf32, #tpu.memory_space<vmem>>, vector<1x32xf32>
    %cst_7 = arith.constant dense<0.000000e+00> : vector<32xf32>
    %6 = vector.multi_reduction <add>, %3, %cst_7 [0] : vector<8x32xf32> to vector<32xf32>
    %7 = vector.shape_cast %6 : vector<32xf32> to vector<1x32xf32>
    %cst_8 = arith.constant 8.000000e+00 : f32
    %8 = vector.broadcast %cst_8 : f32 to vector<1x32xf32>
    %9 = arith.divf %7, %8 : vector<1x32xf32>
    %10 = vector.broadcast %9 : vector<1x32xf32> to vector<8x32xf32>
    %11 = arith.subf %3, %10 : vector<8x32xf32>
    %12 = arith.mulf %11, %11 : vector<8x32xf32>
    %cst_9 = arith.constant dense<0.000000e+00> : vector<32xf32>
    %13 = vector.multi_reduction <add>, %12, %cst_9 [0] : vector<8x32xf32> to vector<32xf32>
    %14 = vector.shape_cast %13 : vector<32xf32> to vector<1x32xf32>
    %cst_10 = arith.constant 8.000000e+00 : f32
    %15 = vector.broadcast %cst_10 : f32 to vector<1x32xf32>
    %16 = arith.divf %14, %15 : vector<1x32xf32>
    %cst_11 = arith.constant 9.99999974E-6 : f32
    %17 = vector.broadcast %cst_11 : f32 to vector<1x32xf32>
    %18 = arith.addf %16, %17 : vector<1x32xf32>
    %19 = math.rsqrt %18 : vector<1x32xf32>
    %20 = arith.mulf %4, %19 : vector<1x32xf32>
    %21 = vector.broadcast %20 : vector<1x32xf32> to vector<8x32xf32>
    %22 = arith.mulf %11, %21 : vector<8x32xf32>
    %23 = vector.broadcast %5 : vector<1x32xf32> to vector<8x32xf32>
    %24 = arith.addf %22, %23 : vector<8x32xf32>
    %cst_12 = arith.constant 0.000000e+00 : f32
    %25 = vector.broadcast %cst_12 : f32 to vector<8x32xf32>
    %26 = arith.cmpf oge, %24, %25 : vector<8x32xf32>
    %cst_13 = arith.constant 0.00999999977 : f32
    %27 = vector.broadcast %cst_13 : f32 to vector<8x32xf32>
    %28 = arith.mulf %27, %24 : vector<8x32xf32>
    %29 = arith.select %26, %24, %28 : vector<8x32xi1>, vector<8x32xf32>
    %c0_14 = arith.constant 0 : index
    %c0_15 = arith.constant 0 : index
    %30 = vector.load %arg3[%c0_14, %c0_15] : memref<32x32xf32, #tpu.memory_space<vmem>>, vector<32x32xf32>
    %cst_16 = arith.constant dense<0.000000e+00> : vector<8x32xf32>
    %31 = tpu.matmul %29, %30, %cst_16 {dimension_numbers = #tpu.dot_dimension_numbers<[1], [0], [0], [1], [0, 0, 1, 1], [], []>} : vector<8x32xf32>, vector<32x32xf32>, vector<8x32xf32> -> vector<8x32xf32>
    %c2 = arith.constant 2 : index
    %c0_17 = arith.constant 0 : index
    %32 = vector.load %arg4[%c2, %c0_17] : memref<4x32xf32, #tpu.memory_space<vmem>>, vector<1x32xf32>
    %c3 = arith.constant 3 : index
    %c0_18 = arith.constant 0 : index
    %33 = vector.load %arg4[%c3, %c0_18] : memref<4x32xf32, #tpu.memory_space<vmem>>, vector<1x32xf32>
    %cst_19 = arith.constant dense<0.000000e+00> : vector<32xf32>
    %34 = vector.multi_reduction <add>, %31, %cst_19 [0] : vector<8x32xf32> to vector<32xf32>
    %35 = vector.shape_cast %34 : vector<32xf32> to vector<1x32xf32>
    %cst_20 = arith.constant 8.000000e+00 : f32
    %36 = vector.broadcast %cst_20 : f32 to vector<1x32xf32>
    %37 = arith.divf %35, %36 : vector<1x32xf32>
    %38 = vector.broadcast %37 : vector<1x32xf32> to vector<8x32xf32>
    %39 = arith.subf %31, %38 : vector<8x32xf32>
    %40 = arith.mulf %39, %39 : vector<8x32xf32>
    %cst_21 = arith.constant dense<0.000000e+00> : vector<32xf32>
    %41 = vector.multi_reduction <add>, %40, %cst_21 [0] : vector<8x32xf32> to vector<32xf32>
    %42 = vector.shape_cast %41 : vector<32xf32> to vector<1x32xf32>
    %cst_22 = arith.constant 8.000000e+00 : f32
    %43 = vector.broadcast %cst_22 : f32 to vector<1x32xf32>
    %44 = arith.divf %42, %43 : vector<1x32xf32>
    %cst_23 = arith.constant 9.99999974E-6 : f32
    %45 = vector.broadcast %cst_23 : f32 to vector<1x32xf32>
    %46 = arith.addf %44, %45 : vector<1x32xf32>
    %47 = math.rsqrt %46 : vector<1x32xf32>
    %48 = arith.mulf %32, %47 : vector<1x32xf32>
    %49 = vector.broadcast %48 : vector<1x32xf32> to vector<8x32xf32>
    %50 = arith.mulf %39, %49 : vector<8x32xf32>
    %51 = vector.broadcast %33 : vector<1x32xf32> to vector<8x32xf32>
    %52 = arith.addf %50, %51 : vector<8x32xf32>
    %cst_24 = arith.constant 0.000000e+00 : f32
    %53 = vector.broadcast %cst_24 : f32 to vector<8x32xf32>
    %54 = arith.cmpf oge, %52, %53 : vector<8x32xf32>
    %cst_25 = arith.constant 0.00999999977 : f32
    %55 = vector.broadcast %cst_25 : f32 to vector<8x32xf32>
    %56 = arith.mulf %55, %52 : vector<8x32xf32>
    %57 = arith.select %54, %52, %56 : vector<8x32xi1>, vector<8x32xf32>
    %c0_26 = arith.constant 0 : index
    %c0_27 = arith.constant 0 : index
    %58 = vector.load %arg5[%c0_26, %c0_27] : memref<33x12xf32, #tpu.memory_space<vmem>>, vector<32x12xf32>
    %cst_28 = arith.constant dense<0.000000e+00> : vector<8x12xf32>
    %59 = tpu.matmul %57, %58, %cst_28 {dimension_numbers = #tpu.dot_dimension_numbers<[1], [0], [0], [1], [0, 0, 1, 1], [], []>} : vector<8x32xf32>, vector<32x12xf32>, vector<8x12xf32> -> vector<8x12xf32>
    %c32 = arith.constant 32 : index
    %c0_29 = arith.constant 0 : index
    %60 = vector.load %arg5[%c32, %c0_29] : memref<33x12xf32, #tpu.memory_space<vmem>>, vector<1x12xf32>
    %61 = vector.broadcast %60 : vector<1x12xf32> to vector<8x12xf32>
    %62 = arith.addf %59, %61 : vector<8x12xf32>
    %63 = math.tanh %62 : vector<8x12xf32>
    %64 = vector.extract_strided_slice %63 {offsets = [0, 0], sizes = [8, 6], strides = [1, 1]} : vector<8x12xf32> to vector<8x6xf32>
    %c0_30 = arith.constant 0 : index
    %c0_31 = arith.constant 0 : index
    %c0_32 = arith.constant 0 : index
    %65 = vector.load %arg6[%c0_30, %c0_31, %c0_32] : memref<1x8x6xf32, #tpu.memory_space<vmem>>, vector<1x8x6xf32>
    %66 = vector.shape_cast %65 : vector<1x8x6xf32> to vector<8x6xf32>
    %67 = vector.shape_cast %64 : vector<8x6xf32> to vector<1x8x6xf32>
    tpu.vector_store %arg6[%c0_30, %c0_31, %c0_32], %67 {strides = array<i32>} : memref<1x8x6xf32, #tpu.memory_space<vmem>>, vector<1x8x6xf32>,
    %68 = vector.extract_strided_slice %63 {offsets = [0, 6], sizes = [8, 6], strides = [1, 1]} : vector<8x12xf32> to vector<8x6xf32>
    %c0_33 = arith.constant 0 : index
    %c0_34 = arith.constant 0 : index
    %c0_35 = arith.constant 0 : index
    %69 = vector.load %arg7[%c0_33, %c0_34, %c0_35] : memref<1x8x6xf32, #tpu.memory_space<vmem>>, vector<1x8x6xf32>
    %70 = vector.shape_cast %69 : vector<1x8x6xf32> to vector<8x6xf32>
    %71 = vector.shape_cast %68 : vector<8x6xf32> to vector<1x8x6xf32>
    tpu.vector_store %arg7[%c0_33, %c0_34, %c0_35], %71 {strides = array<i32>} : memref<1x8x6xf32, #tpu.memory_space<vmem>>, vector<1x8x6xf32>,
    return
  }
  func.func @transform_0(%arg0: i32) -> (i32, i32, i32) {
    %c0_i32 = arith.constant 0 : i32
    %c0_i32_0 = arith.constant 0 : i32
    %c0_i32_1 = arith.constant 0 : i32
    return %arg0, %c0_i32, %c0_i32_0 : i32, i32, i32
  }
  func.func @transform_1(%arg0: i32) -> (i32, i32) {
    %c0_i32 = arith.constant 0 : i32
    %c0_i32_0 = arith.constant 0 : i32
    %c0_i32_1 = arith.constant 0 : i32
    return %c0_i32, %c0_i32_0 : i32, i32
  }
  func.func @transform_2(%arg0: i32) -> (i32, i32) {
    %c0_i32 = arith.constant 0 : i32
    %c0_i32_0 = arith.constant 0 : i32
    %c0_i32_1 = arith.constant 0 : i32
    return %c0_i32, %c0_i32_0 : i32, i32
  }
  func.func @transform_3(%arg0: i32) -> (i32, i32) {
    %c0_i32 = arith.constant 0 : i32
    %c0_i32_0 = arith.constant 0 : i32
    %c0_i32_1 = arith.constant 0 : i32
    return %c0_i32, %c0_i32_0 : i32, i32
  }
  func.func @transform_4(%arg0: i32) -> (i32, i32) {
    %c0_i32 = arith.constant 0 : i32
    %c0_i32_0 = arith.constant 0 : i32
    %c0_i32_1 = arith.constant 0 : i32
    return %c0_i32, %c0_i32_0 : i32, i32
  }
  func.func @transform_5(%arg0: i32) -> (i32, i32, i32) {
    %c0_i32 = arith.constant 0 : i32
    %c0_i32_0 = arith.constant 0 : i32
    %c0_i32_1 = arith.constant 0 : i32
    return %arg0, %c0_i32, %c0_i32_0 : i32, i32, i32
  }
  func.func @transform_6(%arg0: i32) -> (i32, i32, i32) {
    %c0_i32 = arith.constant 0 : i32
    %c0_i32_0 = arith.constant 0 : i32
    %c0_i32_1 = arith.constant 0 : i32
    return %arg0, %c0_i32, %c0_i32_0 : i32, i32, i32
  }
}

</mosaic_0001>

<bundles_post_ra>
// kernel: encoder_forward_stacked.1
= control target key start
LH: loop header
LB: loop body
LE: loop exit
PB: predicated region body
PF: predicated region fallthrough
CT: control target
= control target key end

     0   :  { %s796_s21 = smov 0   ;;  %s869_s0 = inlined_call_operand.vmem [shape: f32[4,8,4], index: 0, kind: input, shape index: {}]   ;;  %s870_s1 = inlined_call_operand.vmem [shape: f32[4,32], index: 1, kind: input, shape index: {}]   ;;  %s871_s2 = inlined_call_operand.vmem [shape: f32[32,32], index: 2, kind: input, shape index: {}]   ;;  %s872_s3 = inlined_call_operand.vmem [shape: f32[4,32], index: 3, kind: input, shape index: {}]   ;;  %s873_s4 = inlined_call_operand.vmem [shape: f32[33,12], index: 4, kind: input, shape index: {}]   ;;  %s874_s5 = inlined_call_operand.vmem [shape: f32[4,8,6], index: 5, kind: output, shape index: {0}]   ;;  %s875_s6 = inlined_call_operand.vmem [shape: f32[4,8,6], index: 6, kind: output, shape index: {1}]  }
   0x1 LB: > { %s663_s22 = sadd.s32 4294967295, %s755_s21   ;;  %p667_p0 = scmp.ge.s32.totalorder %s755_s21, 1  ;;  %s755_s21 = sphi %s796_s21, %s17_s21  }
   0x2   : > { %p214_p1 = scmp.lt.s32.totalorder %s755_s21, 5 }
   0x4   : > { %p215_p2 = pnand %p667_p0, %p214_p1 }
   0x5   : > { %v259_v0 = vld [vmem:[%s870_s1] sm:$0xf] (!%p215_p2)  ;;  %vm264_vm0 = vcmask (!%p215_p2), 1043456   ;;  %p246_p3 = scmp.lt.s32.totalorder (!%p215_p2), %s663_s22, 3  ;;  %v757_v1 = vmov (!%p215_p2), 0.0   ;;  %vm758_vm1 = vmmov (!%p215_p2), 0   ;;  %v363_v31 = vlaneseq (!%p215_p2) }
   0x6   : > { %218 = sbr.rel (%p215_p2) target bundleno = 898 (0x382), region = 40  ;;  %692 = vmatprep.subr.mxu0 (!%p215_p2), %v757_v1  ;;  %694 = vmatprep.mubr.msk.f32.mxu0 (!%p215_p2), %vm758_vm1, %v757_v1  ;;  %vm260_vm2 = vcmask (!%p215_p2), 31744   ;;  %v376_v3 = vld [vmem:[%s871_s2] sm:$0xff] (!%p215_p2)  ;;  %v377_v4 = vld [vmem:[%s871_s2 + $0x8] sm:$0xff] (!%p215_p2)  ;;  %v759_v6 = vmov (!%p215_p2), 0.0|0.0   ;;  %v378_v7 = vld [vmem:[%s871_s2 + $0x10] sm:$0xff] (!%p215_p2) }
   0x7   : > { %693 = vmatpush3.msk.msra.mxu0 (!%p215_p2), %vm264_vm0, %v259_v0  ;;  %705 = vmatprep.mubr.msk.f32.mxu1 (!%p215_p2), %vm758_vm1, %v757_v1  ;;  %v720_v5 = vpack.c.bf16 (!%p215_p2), %v377_v4, %v376_v3  ;;  %v379_v8 = vld [vmem:[%s871_s2 + $0x18] sm:$0xff] (!%p215_p2)  ;;  %vm340_vm3 = vcmask (!%p215_p2), 261120   ;;  %v364_v32 = vshrl.u32 (!%p215_p2), %v363_v31, 7  ;;  %v338_v33 = vld [vmem:[%s872_s3] sm:$0x1] (!%p215_p2)  ;;  %v490_v44 = vld [vmem:[%s873_s4 + $0x8] sm:$0xff] (!%p215_p2) }
   0x8   : > { %719 = vmatprep.subr.bf16.mxu1 (!%p215_p2), %v759_v6  ;;  %725 = vmatprep.subr.bf16.mxu0 (!%p215_p2), %v759_v6  ;;  %v723_v9 = vpack.c.bf16 (!%p215_p2), %v379_v8, %v378_v7  ;;  %v673_v38 = vld [vmem:[%s872_s3 + $0x1] ss:$0 sm:$0xff] (!%p215_p2)  ;;  %v491_v46 = vld [vmem:[%s873_s4 + $0x10] sm:$0xff] (!%p215_p2)  ;;  %v492_v47 = vld [vmem:[%s873_s4 + $0x18] sm:$0xff] (!%p215_p2)  ;;  %vm572_vm6 = vcmask (!%p215_p2), 48128   ;;  %s760_s12 = smov (!%p215_p2), 122  }
   0x9   : > { %721 = vmatpush3.bf16.msra.mxu1 (!%p215_p2), %v720_v5  ;;  %v365_v34 = vsub.s32 (!%p215_p2), 0, %v364_v32  ;;  %v489_v43 = vld [vmem:[%s873_s4] sm:$0xff] (!%p215_p2)  ;;  %v729_v48 = vpack.c.bf16 (!%p215_p2), %v492_v47, %v491_v46 }
   0xa   : > { %722 = vmatprep.subr.bf16.mxu1 (!%p215_p2), %v759_v6  ;;  %v726_v45 = vpack.c.bf16 (!%p215_p2), %v490_v44, %v489_v43 }
   0xd   : > { %s877_s22 = smov (!%p246_p3, %s663_s22), 3  ;;  %724 = vmatpush3.bf16.msra.mxu1 %v723_v9 }
   0xe   : > { %s807_s25 = sshll.u32 %s877_s22, 3 }
   0xf   : > { %s249_s28 = scalar_lea.vmem %s869_s0, %s807_s25  ;;  %s253_s11 = scalar_lea.vmem %s874_s5, %s807_s25 }
  0x10   : > { %v258_v2 = vld [vmem:[%s249_s28] sm:$0xff]  ;;  %s257_s15 = scalar_lea.vmem %s875_s6, %s807_s25 }
  0x11   : > { %695 = vmatmul.mubr.msk.f32.vlgmr.msra.gmra.mrb[0].mxu0 %vm260_vm2, %v258_v2 }
  0x12   : > { %716 = vmatprep.mubr.msk.f32.mxu0 %vm758_vm1, %v757_v1  ;;  %727 = vmatpush3.bf16.msra.mxu0 %v726_v45 }
  0x13   : > { %728 = vmatprep.subr.bf16.mxu0 %v759_v6  ;;  %v453_v6 = vld [vmem:[%s872_s3 + $0x2] sm:$0x1] }
  0x16   : > { %730 = vmatpush3.bf16.msra.mxu0 %v729_v48 }
  0xe4   : > { %v334_v10 = vpop.f32.mrb[0].mxu0 }
  0xe5   : > { %v341_v11 = vsel %vm340_vm3, %v334_v10, 0.0  ;;  %v696_v12 = vpop.f32.mrb[1].mxu0 }
  0xe6   : > { %v342_v13 = vrot.slane %v341_v11, 4 }
  0xe8   : > { %v343_v14 = vadd.f32 %v342_v13, %v341_v11 }
  0xea   : > { %v344_v15 = vrot.slane %v343_v14, 2 }
  0xec   : > { %v345_v16 = vadd.f32 %v344_v15, %v343_v14  ;;  %v676_v15 = vld [vmem:[%s873_s4 + $0x20] ss:$0 sm:$0xff] }
  0xee   : > { %v346_v17 = vrot.slane %v345_v16, 1 }
  0xf0   : > { %v347_v18 = vadd.f32 %v346_v17, %v345_v16 }
  0xf2   : > { %v349_v19 = vmul.f32 0.125, %v347_v18 }
  0xf4   : > { %v350_v20 = vsub.f32 %v334_v10, %v349_v19  ;;  %v675_v10 = vld [vmem:[%s872_s3 + $0x3] ss:$0 sm:$0xff] }
  0xf6   : > { %v351_v21 = vmul.f32 %v350_v20, %v350_v20 }
  0xf8   : > { %v352_v22 = vsel %vm340_vm3, %v351_v21, 0.0 }
  0xf9   : > { %v353_v23 = vrot.slane %v352_v22, 4 }
  0xfb   : > { %v354_v24 = vadd.f32 %v353_v23, %v352_v22 }
  0xfd   : > { %v355_v25 = vrot.slane %v354_v24, 2 }
  0xff   : > { %v356_v26 = vadd.f32 %v355_v25, %v354_v24 }
 0x101   : > { %v357_v27 = vrot.slane %v356_v26, 1 }
 0x103   : > { %v358_v28 = vadd.f32 %v357_v27, %v356_v26 }
 0x105   : > { %v359_v29 = vmul.f32 0.125, %v358_v28 }
 0x107   : > { %v360_v30 = vadd.f32 1e-05, %v359_v29 }
 0x109   : > { %743 = vrsqrt.f32 %v360_v30 }
 0x113   : > { %v744_v35 = vpop.eup %743 }
 0x114   : > { %v362_v36 = vmul.f32 %v744_v35, %v338_v33 }
 0x116   : > { %v366_v37 = vrot.slane %v362_v36, %v365_v34 }
 0x118   : > { %v367_v39 = vmul.f32 %v366_v37, %v350_v20 }
 0x11a   : > { %v372_v40 = vadd.f32 %v673_v38, %v367_v39 }
 0x11c   : > { %vm373_vm4 = vcmp.ge.f32.partialorder %v372_v40, 0.0  ;;  %v374_v41 = vmul.f32 0.01, %v372_v40 }
 0x11e   : > { %v375_v42 = vsel %vm373_vm4, %v372_v40, %v374_v41 }
 0x11f   : > { %706 = vmatmul.mubr.msk.f32.vlgmr.msra.gmra.mrb[0].mxu1 %vm340_vm3, %v375_v42 }
 0x1f2   : > { %v449_v49 = vpop.f32.mrb[0].mxu1 }
 0x1f3   : > { %v455_v50 = vsel %vm340_vm3, %v449_v49, 0.0  ;;  %v707_v51 = vpop.f32.mrb[1].mxu1 }
 0x1f4   : > { %v456_v52 = vrot.slane %v455_v50, 4 }
 0x1f6   : > { %v457_v53 = vadd.f32 %v456_v52, %v455_v50 }
 0x1f8   : > { %v458_v54 = vrot.slane %v457_v53, 2 }
 0x1fa   : > { %v459_v55 = vadd.f32 %v458_v54, %v457_v53 }
 0x1fc   : > { %v460_v56 = vrot.slane %v459_v55, 1 }
 0x1fe   : > { %v461_v57 = vadd.f32 %v460_v56, %v459_v55 }
 0x200   : > { %v462_v58 = vmul.f32 0.125, %v461_v57 }
 0x202   : > { %v463_v59 = vsub.f32 %v449_v49, %v462_v58 }
 0x204   : > { %v464_v60 = vmul.f32 %v463_v59, %v463_v59 }
 0x206   : > { %v465_v61 = vsel %vm340_vm3, %v464_v60, 0.0 }
 0x207   : > { %v466_v62 = vrot.slane %v465_v61, 4 }
 0x209   : > { %v467_v63 = vadd.f32 %v466_v62, %v465_v61 }
 0x20b   : > { %v468_v0 = vrot.slane %v467_v63, 2 }
 0x20d   : > { %v469_v1 = vadd.f32 %v468_v0, %v467_v63 }
 0x20f   : > { %v470_v2 = vrot.slane %v469_v1, 1 }
 0x211   : > { %v471_v3 = vadd.f32 %v470_v2, %v469_v1 }
 0x213   : > { %v472_v4 = vmul.f32 0.125, %v471_v3 }
 0x215   : > { %v473_v5 = vadd.f32 1e-05, %v472_v4 }
 0x217   : > { %745 = vrsqrt.f32 %v473_v5 }
 0x221   : > { %v746_v7 = vpop.eup %745 }
 0x222   : > { %v475_v8 = vmul.f32 %v746_v7, %v453_v6 }
 0x224   : > { %v479_v9 = vrot.slane %v475_v8, %v365_v34 }
 0x226   : > { %v480_v11 = vmul.f32 %v479_v9, %v463_v59 }
 0x228   : > { %v485_v12 = vadd.f32 %v675_v10, %v480_v11 }
 0x22a   : > { %vm486_vm5 = vcmp.ge.f32.partialorder %v485_v12, 0.0  ;;  %v487_v13 = vmul.f32 0.01, %v485_v12 }
 0x22c   : > { %v488_v14 = vsel %vm486_vm5, %v485_v12, %v487_v13 }
 0x22d   : > { %717 = vmatmul.mubr.msk.f32.vlgmr.msra.gmra.mrb[2].mxu0 %vm340_vm3, %v488_v14 }
 0x300   : > { %v567_v16 = vpop.f32.mrb[2].mxu0 }
 0x301   : > { %v568_v17 = vadd.f32 %v676_v15, %v567_v16  ;;  %v718_v18 = vpop.f32.mrb[3].mxu0 }
 0x303   : > { %747 = vtanh.f32 %v568_v17 }
 0x30d   : > { %v748_v19 = vpop.eup %747 }
 0x30e   : > { %575 = vrot.lane.b32.xlu0 %v748_v19, %s760_s12  ;;  %573 = vst.msk [vmem:[%s253_s11] sm:$0xff] %vm572_vm6, %v748_v19 }
 0x380   : > { %v576_v20 = vpop.permute.xlu0 %575 }
 0x381   : > { %578 = vst.msk [vmem:[%s257_s15] sm:$0xff] %vm572_vm6, %v576_v20 }
 0x382 PF: > { %s17_s21 = sadd.s32 1, %s755_s21  }
 0x383   : > { %p14_p4 = scmp.ge.s32.totalorder %s17_s21, 6  }
 0x385   :  { %16 = sbr.rel (!%p14_p4) target bundleno = 1 (0x1), region = 82 }

</bundles_post_ra>
